<compile_context>
chip_gen: v7x
topology: tpu7x:2x2x1
jax: 0.10.0
libtpu: 0.0.40
codegen_flags: <defaults>
</compile_context>

<pallas_src>
import functools

import jax
import jax.numpy as jnp
from jax.experimental import pallas as pl
from jax.experimental.pallas import tpu as pltpu

MARGIN = 0.1
EPS = 1e-6


def _triplet_kernel(a_ref, dap_ref, n_ref, out_ref, *, n_total, block_n):
    a = a_ref[...]                                      # (B, D) f32, already has +EPS
    d_ap = dap_ref[...]                                 # (B, 1) f32
    n = n_ref[...].astype(jnp.float32)                  # (B, block_n, D)

    diff = a[:, None, :] - n                            # (B, block_n, D)
    d_an = jnp.sqrt(jnp.sum(diff * diff, axis=-1))      # (B, block_n)

    loss = jnp.maximum(d_ap - d_an + MARGIN, 0.0)       # (B, block_n)

    # Mask out padded negatives in the last (ragged) chunk.  Static check so
    # the common (evenly divisible) path carries no per-element select.
    if n_total % block_n != 0:
        j = pl.program_id(0)
        neg_idx = j * block_n + jax.lax.broadcasted_iota(jnp.int32, loss.shape, 1)
        loss = jnp.where(neg_idx < n_total, loss, 0.0)

    # Per-negative partial sums over the batch; lane-dense (1, block_n) store.
    out_ref[...] = jnp.sum(loss, axis=0, keepdims=True)


def _choose_block_n(B, N, D):
    # Target ~4 MiB f32 working set per negatives slab.
    target_f32_bytes = 4 << 20
    bn = target_f32_bytes // max(1, B * D * 4)
    bn = max(128, (bn // 128) * 128)          # 128-aligned (lane-dense output)
    if N <= bn:
        if N >= 256:
            # Guarantee >= 2 chunks so both v7x TensorCores get work.
            return int(((-(-N // 2)) + 127) // 128 * 128)
        return int(N)                         # single chunk; block == full dim
    return int(bn)


def multi_negative_triplet_loss(anchor, positive, negatives, *, block_n=None):
    """anchor: (B, D), positive: (B, D), negatives: (B, N, D) -> scalar f32."""
    B, D = anchor.shape
    N = negatives.shape[1]

    # Loop-invariant pieces, computed once in the wrapper (tiny: B x D work):
    #   * anchor in f32 with the pairwise_distance EPS pre-added
    #   * anchor-positive distance d_ap as a (B, 1) f32 column.
    a32 = anchor.astype(jnp.float32)
    p32 = positive.astype(jnp.float32)
    a_eps = a32 + EPS
    d_ap = jnp.sqrt(jnp.sum((a32 - p32 + EPS) ** 2, axis=-1, keepdims=True))

    if block_n is None:
        block_n = _choose_block_n(B, N, D)
    num_chunks = pl.cdiv(N, block_n)

    partial = pl.pallas_call(
        functools.partial(_triplet_kernel, n_total=N, block_n=block_n),
        out_shape=jax.ShapeDtypeStruct((num_chunks, block_n), jnp.float32),
        grid_spec=pltpu.PrefetchScalarGridSpec(
            num_scalar_prefetch=0,
            grid=(num_chunks,),
            in_specs=[
                pl.BlockSpec((B, D), lambda j: (0, 0)),              # anchor+eps (resident)
                pl.BlockSpec((B, 1), lambda j: (0, 0)),              # d_ap       (resident)
                pl.BlockSpec((B, block_n, D), lambda j: (0, j, 0)),  # negatives chunk
            ],
            out_specs=pl.BlockSpec((1, block_n), lambda j: (j, 0)),
        ),
        compiler_params=pltpu.CompilerParams(
            dimension_semantics=("parallel",),
            vmem_limit_bytes=32 * 1024 * 1024,
        ),
    )(a_eps, d_ap, negatives)

    # Final reduction: sum of all per-(batch, negative) losses / (B * N).
    return jnp.sum(partial) / (B * N)


def _reference(anchor, positive, negatives):
    a = anchor.astype(jnp.float32)
    p = positive.astype(jnp.float32)
    n = negatives.astype(jnp.float32)                                    # (B, N, D)
    d_ap = jnp.sqrt(jnp.sum((a - p + EPS) ** 2, axis=-1))                # (B,)
    d_an = jnp.sqrt(jnp.sum((a[:, None, :] - n + EPS) ** 2, axis=-1))    # (B, N)
    loss = jnp.maximum(d_ap[:, None] - d_an + MARGIN, 0.0)               # (B, N)
    return jnp.mean(jnp.mean(loss, axis=0))                              # mean over negs of batch-means


if __name__ == "__main__":
    key = jax.random.PRNGKey(0)
    B, N, D = 8, 4, 128
    k1, k2, k3 = jax.random.split(key, 3)
    anchor = jax.random.normal(k1, (B, D), dtype=jnp.float32)
    positive = jax.random.normal(k2, (B, D), dtype=jnp.float32)
    negatives = jax.random.normal(k3, (B, N, D), dtype=jnp.float32)

    # Default heuristic, single small chunk (block == full negative dim).
    out = jax.block_until_ready(multi_negative_triplet_loss(anchor, positive, negatives))
    ref = jax.block_until_ready(_reference(anchor, positive, negatives))
    assert jnp.allclose(out, ref, atol=1e-5, rtol=1e-5), (out, ref)

    # Explicit multi-chunk path (grid > 1, "parallel" chunk axis).
    negatives2 = jax.random.normal(jax.random.PRNGKey(1), (B, 16, D), dtype=jnp.float32)
    out2 = jax.block_until_ready(
        multi_negative_triplet_loss(anchor, positive, negatives2, block_n=8))
    ref2 = jax.block_until_ready(_reference(anchor, positive, negatives2))
    assert jnp.allclose(out2, ref2, atol=1e-5, rtol=1e-5), (out2, ref2)

    # Ragged last chunk (N not a multiple of block_n -> masking path).
    negatives3 = jax.random.normal(jax.random.PRNGKey(2), (B, 20, D), dtype=jnp.float32)
    out3 = jax.block_until_ready(
        multi_negative_triplet_loss(anchor, positive, negatives3, block_n=8))
    ref3 = jax.block_until_ready(_reference(anchor, positive, negatives3))
    assert jnp.allclose(out3, ref3, atol=1e-5, rtol=1e-5), (out3, ref3)

    # Default heuristic with larger N: 128-aligned block_n, >=2 chunks, ragged tail.
    negatives4 = jax.random.normal(jax.random.PRNGKey(3), (B, 300, D), dtype=jnp.float32)
    out4 = jax.block_until_ready(multi_negative_triplet_loss(anchor, positive, negatives4))
    ref4 = jax.block_until_ready(_reference(anchor, positive, negatives4))
    assert jnp.allclose(out4, ref4, atol=1e-5, rtol=1e-5), (out4, ref4)

    print("KERNEL_OK")
</pallas_src>

<mosaic_0001>
module attributes {stable_mosaic.version = 11 : i64} {
  func.func @_triplet_kernel(%arg0: i32, %arg1: memref<8x128xf32, #tpu.memory_space<vmem>>, %arg2: memref<8x1xf32, #tpu.memory_space<vmem>>, %arg3: memref<8x4x128xf32, #tpu.memory_space<vmem>>, %arg4: memref<1x4xf32, #tpu.memory_space<vmem>>) attributes {dimension_semantics = [#tpu.dimension_semantics<parallel>], iteration_bounds = array<i64: 1>, scalar_prefetch = 0 : i64, scratch_operands = 0 : i64, tpu.core_type = #tpu.core_type<tc>, window_params = [{pipeline_mode = #tpu.pipeline_mode<synchronous>, transform_indices = @transform_0, window_bounds = array<i64: 8, 128>}, {pipeline_mode = #tpu.pipeline_mode<synchronous>, transform_indices = @transform_1, window_bounds = array<i64: 8, 1>}, {transform_indices = @transform_2, window_bounds = array<i64: 8, 4, 128>}, {transform_indices = @transform_3, window_bounds = array<i64: 1, 4>}]} {
    %c0 = arith.constant 0 : index
    %c0_0 = arith.constant 0 : index
    %0 = vector.load %arg1[%c0, %c0_0] : memref<8x128xf32, #tpu.memory_space<vmem>>, vector<8x128xf32>
    %c0_1 = arith.constant 0 : index
    %c0_2 = arith.constant 0 : index
    %1 = vector.load %arg2[%c0_1, %c0_2] : memref<8x1xf32, #tpu.memory_space<vmem>>, vector<8x1xf32>
    %c0_3 = arith.constant 0 : index
    %c0_4 = arith.constant 0 : index
    %c0_5 = arith.constant 0 : index
    %2 = vector.load %arg3[%c0_3, %c0_4, %c0_5] : memref<8x4x128xf32, #tpu.memory_space<vmem>>, vector<8x4x128xf32>
    %3 = vector.shape_cast %0 : vector<8x128xf32> to vector<8x1x128xf32>
    %4 = vector.broadcast %3 : vector<8x1x128xf32> to vector<8x4x128xf32>
    %5 = arith.subf %4, %2 : vector<8x4x128xf32>
    %6 = arith.mulf %5, %5 : vector<8x4x128xf32>
    %cst = arith.constant dense<0.000000e+00> : vector<8x4xf32>
    %7 = vector.multi_reduction <add>, %6, %cst [2] : vector<8x4x128xf32> to vector<8x4xf32>
    %8 = math.sqrt %7 : vector<8x4xf32>
    %9 = vector.broadcast %1 : vector<8x1xf32> to vector<8x4xf32>
    %10 = arith.subf %9, %8 : vector<8x4xf32>
    %cst_6 = arith.constant 1.000000e-01 : f32
    %11 = vector.broadcast %cst_6 : f32 to vector<8x4xf32>
    %12 = arith.addf %10, %11 : vector<8x4xf32>
    %cst_7 = arith.constant 0.000000e+00 : f32
    %13 = vector.broadcast %cst_7 : f32 to vector<8x4xf32>
    %14 = arith.maximumf %12, %13 : vector<8x4xf32>
    %cst_8 = arith.constant dense<0.000000e+00> : vector<4xf32>
    %15 = vector.multi_reduction <add>, %14, %cst_8 [0] : vector<8x4xf32> to vector<4xf32>
    %16 = vector.shape_cast %15 : vector<4xf32> to vector<1x4xf32>
    %c0_9 = arith.constant 0 : index
    %c0_10 = arith.constant 0 : index
    %17 = vector.load %arg4[%c0_9, %c0_10] : memref<1x4xf32, #tpu.memory_space<vmem>>, vector<1x4xf32>
    tpu.vector_store %arg4[%c0_9, %c0_10], %16 {strides = array<i32>} : memref<1x4xf32, #tpu.memory_space<vmem>>, vector<1x4xf32>,
    return
  }
  func.func @transform_0(%arg0: i32) -> (i32, i32) {
    %c0_i32 = arith.constant 0 : i32
    %c0_i32_0 = arith.constant 0 : i32
    %c0_i32_1 = arith.constant 0 : i32
    return %c0_i32, %c0_i32_0 : i32, i32
  }
  func.func @transform_1(%arg0: i32) -> (i32, i32) {
    %c0_i32 = arith.constant 0 : i32
    %c0_i32_0 = arith.constant 0 : i32
    %c0_i32_1 = arith.constant 0 : i32
    return %c0_i32, %c0_i32_0 : i32, i32
  }
  func.func @transform_2(%arg0: i32) -> (i32, i32, i32) {
    %c0_i32 = arith.constant 0 : i32
    %c0_i32_0 = arith.constant 0 : i32
    %c0_i32_1 = arith.constant 0 : i32
    return %c0_i32, %arg0, %c0_i32_0 : i32, i32, i32
  }
  func.func @transform_3(%arg0: i32) -> (i32, i32) {
    %c0_i32 = arith.constant 0 : i32
    %c0_i32_0 = arith.constant 0 : i32
    return %arg0, %c0_i32 : i32, i32
  }
}

</mosaic_0001>

<bundles_post_ra>
// kernel: tpu_custom_call.1
= control target key start
LH: loop header
LB: loop body
LE: loop exit
PB: predicated region body
PF: predicated region fallthrough
CT: control target
= control target key end

     0   :  { %8 = vsyncpa [#allocation3], 0  ;;  %s492_s0 = inlined_call_operand.vmem [shape: f32[8,128], index: 0, kind: input, shape index: {}]   ;;  %s493_s1 = inlined_call_operand.vmem [shape: f32[8,1], index: 1, kind: input, shape index: {}]   ;;  %s494_s2 = inlined_call_operand.hbm [shape: f32[8,4,128], index: 2, kind: input, shape index: {}]   ;;  %s495_s3 = inlined_call_operand.hbm [shape: f32[1,4], index: 3, kind: output, shape index: {}]  }
   0x1   :  { %9 = vsyncpa [#allocation4], 0  ;;  %s388_s12 = smov [#allocation2]   ;;  %s340_s16 = scalar_lea.hbm %s494_s2, 512 }
   0x2   :  { %s19_s13 = sshll.u32 %s388_s12, 4  ;;  %p341_p0 = scmp.ne.s32.totalorder %s494_s2, %s340_s16  ;;  %s20_s13 = int_to_ptr.vmem [resolvable:$true] %s19_s13 }
   0x3   :  { %p344_p1 = scmp.lt.u32.totalorder %s340_s16, %s494_s2 }
   0x5   :  { %p346_p2 = pnand %p344_p1, %p341_p0 }
   0x7   :  { %349 = shalt.err (!%p346_p2)
}
   0x8   :  { %s350_s21 = scalar_lea.vmem %s20_s13, 512  ;;  %p355_p4 = scmp.lt.s32.totalorder %s20_s13, %s20_s13 }
   0x9   :  { %p351_p3 = scmp.ne.s32.totalorder %s20_s13, %s350_s21  ;;  %p356_p5 = scmp.lt.s32.totalorder %s350_s21, %s350_s21 }
   0xb   :  { %p357_p6 = por %p356_p5, %p355_p4 }
   0xd   :  { %p358_p7 = pnand %p357_p6, %p351_p3 }
   0xf   :  { %361 = shalt.err (!%p358_p7)
}
  0x10   :  { %s389_s22 = smov 64   ;;  %s390_s23 = smov 4  }
  0x11   :  { %25 = dma.hbm_to_vmem [thread:$0]  %s494_s2, 512, %s20_s13, [#allocation3], %s389_s22, %s389_s22, %s390_s23  }
  0x12   :  { %384 = dma.done.wait [#allocation3], 512  }
  0x13   :  { %385 = vsyncadd [#allocation3], 4294966784  ;;  %v44_v0 = vlaneseq  ;;  %v391_v1 = vmov 1966171168   ;;  %v392_v3 = vmov 0   ;;  %v29_v9 = vld [vmem:[%s492_s0] sm:$0xff] }
  0x14   :  { %v42_v2 = vunpack.c.l.s4 %v391_v1  ;;  %322 = vset.pattern.permute.xlu0 %v392_v3  ;;  %v40_v12 = vcombine.high %v29_v9, %v29_v9  ;;  %v31_v16 = vld [vmem:[#allocation2] sm:$0xf]  ;;  %v33_v21 = vld [vmem:[#allocation2 + $0x8] sm:$0xf]  ;;  %v32_v22 = vld [vmem:[#allocation2 + $0x4] sm:$0xf] }
  0x15   :  { %v45_v4 = vshrl.u32 %v44_v0, 7  ;;  %v240_v5 = vand.u32 127, %v44_v0  ;;  %v35_v28 = vld [vmem:[#allocation2 + $0x10] sm:$0xf]  ;;  %vm145_vm0 = vcmask 1043456   ;;  %v30_v0 = vld [vmem:[%s493_s1] sm:$0xff] }
  0x16   :  { %v43_v6 = vunpack.c.0.s8 %v42_v2  ;;  %v34_v29 = vld [vmem:[#allocation2 + $0xc] sm:$0xf]  ;;  %v36_v37 = vld [vmem:[#allocation2 + $0x14] sm:$0xf]  ;;  %v37_v40 = vld [vmem:[#allocation2 + $0x18] sm:$0xf] }
  0x17   :  { %v426_v7 = vsub.s32 %v240_v5, %v45_v4  ;;  %v91_v11 = vsub.s32 0, %v45_v4  ;;  %v38_v49 = vld [vmem:[#allocation2 + $0x1c] sm:$0xf]  ;;  %vm273_vm2 = vcmask 1041409   ;;  %vm275_vm3 = vcmask 1042434   ;;  %s393_s1 = smov [#allocation5]  }
  0x18   :  { %v46_v8 = vsub.s32 %v43_v6, %v45_v4  ;;  %vm277_vm5 = vcmask 1043459   ;;  %vm279_vm8 = vcmask 1044484   ;;  %vm281_vm12 = vcmask 1045509   ;;  %s307_s28 = sshll.u32 %s393_s1, 4  ;;  %s308_s28 = int_to_ptr.vmem [resolvable:$true] %s307_s28 }
  0x19   :  { %s362_s29 = scalar_lea.vmem %s308_s28, 16  ;;  %s366_s30 = scalar_lea.vmem %s308_s28, 32 }
  0x1a   :  { %v47_v10 = vrot.slane %v29_v9, %v46_v8  ;;  %v54_v15 = vrot.slane %v40_v12, %v46_v8  ;;  %p363_p8 = scmp.ne.s32.totalorder %s308_s28, %s362_s29  ;;  %p367_p9 = scmp.lt.s32.totalorder %s308_s28, %s308_s28 }
  0x1b   :  { %p368_p10 = scmp.lt.s32.totalorder %s366_s30, %s362_s29 }
  0x1c   :  { %v63_v13 = vrot.slane %v47_v10, %v46_v8  ;;  %v55_v14 = vcombine.high %v47_v10, %v47_v10  ;;  %v70_v20 = vrot.slane %v54_v15, %v46_v8  ;;  %v56_v23 = vcombine.high %v54_v15, %v54_v15 }
  0x1d   :  { %p369_p11 = por %p368_p10, %p367_p9 }
  0x1e   :  { %v92_v17 = vrot.slane %v63_v13, %v91_v11  ;;  %v85_v18 = vcombine.high %v63_v13, %v63_v13  ;;  %v77_v19 = vrot.slane %v55_v14, %v46_v8  ;;  %v108_v30 = vrot.slane %v70_v20, %v91_v11 }
  0x1f   :  { %v84_v31 = vrot.slane %v56_v23, %v46_v8  ;;  %v86_v32 = vcombine.high %v70_v20, %v70_v20  ;;  %p370_p12 = pnand %p369_p11, %p363_p8 }
  0x20   :  { %v129_v24 = vsub.f32 %v92_v17, %v31_v16  ;;  %v100_v25 = vrot.slane %v85_v18, %v91_v11  ;;  %v96_v26 = vrot.slane %v77_v19, %v91_v11  ;;  %v87_v27 = vcombine.high %v77_v19, %v77_v19 }
  0x21   :  { %v133_v38 = vsub.f32 %v108_v30, %v35_v28  ;;  %v112_v39 = vrot.slane %v84_v31, %v91_v11  ;;  %v116_v41 = vrot.slane %v86_v32, %v91_v11  ;;  %v88_v42 = vcombine.high %v84_v31, %v84_v31 }
  0x22   :  { %v137_v33 = vmul.f32 %v129_v24, %v129_v24  ;;  %v131_v34 = vsub.f32 %v100_v25, %v33_v21  ;;  %v130_v35 = vsub.f32 %v96_v26, %v32_v22  ;;  %v104_v36 = vrot.slane %v87_v27, %v91_v11 }
  0x23   :  { %v141_v47 = vmul.f32 %v133_v38, %v133_v38  ;;  %v134_v48 = vsub.f32 %v112_v39, %v36_v37  ;;  %v120_v50 = vrot.slane %v88_v42, %v91_v11  ;;  %v135_v54 = vsub.f32 %v116_v41, %v37_v40 }
  0x24   :  { %v146_v43 = vsel %vm145_vm0, %v137_v33, 0.0  ;;  %v139_v44 = vmul.f32 %v131_v34, %v131_v34  ;;  %v138_v45 = vmul.f32 %v130_v35, %v130_v35  ;;  %v132_v46 = vsub.f32 %v104_v36, %v34_v29 }
  0x25   :  { %147 = vadd.xlane.f32.xlu0 %v146_v43  ;;  %v142_v56 = vmul.f32 %v134_v48, %v134_v48  ;;  %v136_v57 = vsub.f32 %v120_v50, %v38_v49  ;;  %v158_v58 = vsel %vm145_vm0, %v141_v47, 0.0  ;;  %v143_v59 = vmul.f32 %v135_v54, %v135_v54 }
  0x26   :  { %v152_v51 = vsel %vm145_vm0, %v139_v44, 0.0  ;;  %v149_v52 = vsel %vm145_vm0, %v138_v45, 0.0  ;;  %v140_v53 = vmul.f32 %v132_v46, %v132_v46 }
  0x27   :  { %153 = vadd.xlane.f32.xlu1 %v152_v51  ;;  %v161_v60 = vsel %vm145_vm0, %v142_v56, 0.0  ;;  %v144_v61 = vmul.f32 %v136_v57, %v136_v57  ;;  %v164_v62 = vsel %vm145_vm0, %v143_v59, 0.0 }
  0x28   :  { %v155_v55 = vsel %vm145_vm0, %v140_v53, 0.0 }
  0x29   :  { %150 = vadd.xlane.f32.xlu0 %v149_v52  ;;  %v167_v63 = vsel %vm145_vm0, %v144_v61, 0.0 }
  0x2b   :  { %156 = vadd.xlane.f32.xlu1 %v155_v55 }
  0x2d   :  { %159 = vadd.xlane.f32.xlu0 %v158_v58 }
  0x2f   :  { %162 = vadd.xlane.f32.xlu1 %v161_v60 }
  0x31   :  { %165 = vadd.xlane.f32.xlu0 %v164_v62 }
  0x33   :  { %168 = vadd.xlane.f32.xlu1 %v167_v63 }
  0x47   :  { %228 = vperm.xlu0 %322, %v30_v0  }
  0xb2   :  { %v148_v1 = vpop.xlane.xlu0 %147 }
  0xb3   :  { %324 = vrsqrt.f32 %v148_v1  ;;  %vm172_vm1 = vcmp.eq.f32.partialorder %v148_v1, inf  ;;  %vm174_vm4 = vcmp.eq.f32.partialorder %v148_v1, 0.0  ;;  %v175_v16 = vand.u32 2147483648, %v148_v1 }
  0xb4   :  { %v154_v2 = vpop.xlane.xlu1 %153 }
  0xb5   :  { %326 = vrsqrt.f32 %v154_v2  ;;  %vm186_vm6 = vcmp.eq.f32.partialorder %v154_v2, inf  ;;  %vm188_vm7 = vcmp.eq.f32.partialorder %v154_v2, 0.0  ;;  %v189_v18 = vand.u32 2147483648, %v154_v2 }
  0xb6   :  { %v151_v3 = vpop.xlane.xlu0 %150 }
  0xb7   :  { %328 = vrsqrt.f32 %v151_v3  ;;  %vm179_vm9 = vcmp.eq.f32.partialorder %v151_v3, inf  ;;  %vm181_vm10 = vcmp.eq.f32.partialorder %v151_v3, 0.0  ;;  %v182_v22 = vand.u32 2147483648, %v151_v3 }
  0xb8   :  { %v157_v4 = vpop.xlane.xlu1 %156 }
  0xb9   :  { %330 = vrsqrt.f32 %v157_v4  ;;  %vm193_vm11 = vcmp.eq.f32.partialorder %v157_v4, inf  ;;  %vm195_vm13 = vcmp.eq.f32.partialorder %v157_v4, 0.0  ;;  %v196_v28 = vand.u32 2147483648, %v157_v4 }
  0xba   :  { %v160_v5 = vpop.xlane.xlu0 %159 }
  0xbb   :  { %332 = vrsqrt.f32 %v160_v5  ;;  %vm200_vm14 = vcmp.eq.f32.partialorder %v160_v5, inf  ;;  %vm202_vm15 = vcmp.eq.f32.partialorder %v160_v5, 0.0  ;;  %v203_v36 = vand.u32 2147483648, %v160_v5 }
  0xbc   :  { %v442_v6 = vpop.xlane.xlu1 %162 }
  0xbd   :  { %v325_v8 = vpop.eup %324  ;;  %334 = vrsqrt.f32 %v442_v6  ;;  %vm207_vm0 = vcmp.eq.f32.partialorder %v442_v6, inf  ;;  %v210_v42 = vand.u32 2147483648, %v442_v6 }
  0xbe   :  { %v171_v9 = vmul.f32 %v325_v8, %v148_v1  ;;  %v445_v10 = vpop.xlane.xlu0 %165 }
  0xbf   :  { %v327_v11 = vpop.eup %326  ;;  %336 = vrsqrt.f32 %v445_v10  ;;  %v217_v50 = vand.u32 2147483648, %v445_v10 }
  0xc0   :  { %v173_v12 = vsel %vm172_vm1, %v148_v1, %v171_v9  ;;  %v185_v13 = vmul.f32 %v327_v11, %v154_v2  ;;  %v448_v14 = vpop.xlane.xlu1 %168  ;;  %vm209_vm1 = vcmp.eq.f32.partialorder %v442_v6, 0.0 }
  0xc1   :  { %v329_v15 = vpop.eup %328  ;;  %338 = vrsqrt.f32 %v448_v14  ;;  %v176_v21 = vsel %vm174_vm4, %v175_v16, %v173_v12  ;;  %vm216_vm4 = vcmp.eq.f32.partialorder %v445_v10, 0.0  ;;  %v224_v56 = vand.u32 2147483648, %v448_v14 }
  0xc2   :  { %v187_v17 = vsel %vm186_vm6, %v154_v2, %v185_v13  ;;  %v178_v19 = vmul.f32 %v329_v15, %v151_v3  ;;  %v244_v29 = vrot.slane %v176_v21, %v426_v7  ;;  %vm223_vm6 = vcmp.eq.f32.partialorder %v448_v14, 0.0 }
  0xc3   :  { %v331_v20 = vpop.eup %330  ;;  %v190_v23 = vsel %vm188_vm7, %v189_v18, %v187_v17  ;;  %vm285_vm7 = vcmask 1047559  }
  0xc4   :  { %v180_v24 = vsel %vm179_vm9, %v151_v3, %v178_v19  ;;  %v192_v25 = vmul.f32 %v331_v20, %v157_v4  ;;  %v252_v34 = vrot.slane %v190_v23, %v426_v7  ;;  %vm299_vm9 = vcmask 24576  }
  0xc5   :  { %v333_v26 = vpop.eup %332  ;;  %v183_v27 = vsel %vm181_vm10, %v182_v22, %v180_v24 }
  0xc6   :  { %v248_v30 = vrot.slane %v183_v27, %v426_v7  ;;  %v194_v31 = vsel %vm193_vm11, %v157_v4, %v192_v25  ;;  %v199_v32 = vmul.f32 %v333_v26, %v160_v5  ;;  %v229_v62 = vpop.permute.xlu0 %228 }
  0xc7   :  { %v335_v33 = vpop.eup %334  ;;  %v197_v35 = vsel %vm195_vm13, %v196_v28, %v194_v31 }
  0xc8   :  { %v201_v37 = vsel %vm200_vm14, %v160_v5, %v199_v32  ;;  %v206_v38 = vmul.f32 %v335_v33, %v442_v6  ;;  %v256_v39 = vrot.slane %v197_v35, %v426_v7  ;;  %v274_v40 = vsel %vm273_vm2, %v248_v30, %v244_v29 }
  0xc9   :  { %v337_v41 = vpop.eup %336  ;;  %v204_v43 = vsel %vm202_vm15, %v203_v36, %v201_v37  ;;  %v276_v44 = vsel %vm275_vm3, %v252_v34, %v274_v40  ;;  %vm214_vm2 = vcmp.eq.f32.partialorder %v445_v10, inf  ;;  %vm221_vm3 = vcmp.eq.f32.partialorder %v448_v14, inf }
  0xca   :  { %v208_v45 = vsel %vm207_vm0, %v442_v6, %v206_v38  ;;  %v213_v46 = vmul.f32 %v337_v41, %v445_v10  ;;  %v260_v47 = vrot.slane %v204_v43, %v426_v7  ;;  %v278_v48 = vsel %vm277_vm5, %v256_v39, %v276_v44 }
  0xcb   :  { %v339_v49 = vpop.eup %338  ;;  %v211_v51 = vsel %vm209_vm1, %v210_v42, %v208_v45  ;;  %vm283_vm5 = vcmask 1046534  }
  0xcc   :  { %v220_v52 = vmul.f32 %v339_v49, %v448_v14  ;;  %v215_v53 = vsel %vm214_vm2, %v445_v10, %v213_v46  ;;  %v280_v54 = vsel %vm279_vm8, %v260_v47, %v278_v48  ;;  %v264_v55 = vrot.slane %v211_v51, %v426_v7 }
  0xcd   :  { %v218_v57 = vsel %vm216_vm4, %v217_v50, %v215_v53  ;;  %vm291_vm8 = vcmask 31744  }
  0xce   :  { %v222_v58 = vsel %vm221_vm3, %v448_v14, %v220_v52  ;;  %v268_v59 = vrot.slane %v218_v57, %v426_v7  ;;  %v282_v60 = vsel %vm281_vm12, %v264_v55, %v280_v54 }
  0xcf   :  { %v225_v61 = vsel %vm223_vm6, %v224_v56, %v222_v58 }
  0xd0   :  { %v272_v63 = vrot.slane %v225_v61, %v426_v7  ;;  %v284_v0 = vsel %vm283_vm5, %v268_v59, %v282_v60 }
  0xd2   :  { %v286_v1 = vsel %vm285_vm7, %v272_v63, %v284_v0 }
  0xd3   :  { %v288_v2 = vsub.f32 %v229_v62, %v286_v1 }
  0xd5   :  { %v289_v3 = vadd.f32 0.1, %v288_v2 }
  0xd7   :  { %v290_v4 = vmax.f32 %v289_v3, 0.0 }
  0xd9   :  { %v292_v5 = vsel %vm291_vm8, %v290_v4, 0.0 }
  0xda   :  { %v293_v6 = vrot.slane %v292_v5, 4 }
  0xdc   :  { %v294_v8 = vadd.f32 %v293_v6, %v292_v5 }
  0xde   :  { %v295_v9 = vrot.slane %v294_v8, 2 }
  0xe0   :  { %v296_v10 = vadd.f32 %v295_v9, %v294_v8 }
  0xe2   :  { %v297_v11 = vrot.slane %v296_v10, 1 }
  0xe4   :  { %v298_v12 = vadd.f32 %v297_v11, %v296_v10 }
  0xe6   :  { %300 = vst.msk [vmem:[#allocation5] sm:$0x1] %vm299_vm9, %v298_v12 }
  0xe7   :  { %373 = shalt.err (!%p370_p12)
}
  0xe8   :  { %s374_s6 = scalar_lea.hbm %s495_s3, 16 }
  0xe9   :  { %p375_p13 = scmp.ne.s32.totalorder %s495_s3, %s374_s6  ;;  %p378_p0 = scmp.lt.u32.totalorder %s374_s6, %s495_s3 }
  0xeb   :  { %p380_p1 = pnand %p378_p0, %p375_p13 }
  0xed   :  { %383 = shalt.err (!%p380_p1)
}
  0xee   :  { %310 = dma.vmem_to_hbm [thread:$0]  %s308_s28, 16, %s495_s3, [#allocation4]  }
  0xef   :  { %386 = dma.done.wait [#allocation4], 16  }
  0xf0   :  { %387 = vsyncadd [#allocation4], 4294967280 }
  0xf1   :  { %314 = vsyncpa [#allocation3], 1 }
  0xf2   :  { %315 = vsyncpa [#allocation4], 1 }

</bundles_post_ra>
